<compile_context>
chip_gen: v5e
topology: v5e:2x2
jax: 0.10.0
libtpu: 0.0.40
codegen_flags: <defaults>
</compile_context>

<pallas_src>
import jax
import jax.numpy as jnp
from jax.experimental import pallas as pl
from jax.experimental.pallas import tpu as pltpu


# ----------------------------- kernel -------------------------------------- #

def _make_kernel(use_vpu_conv: bool):
    def kernel(x_ref, scale_ref, wc_ref, bc_ref, o_ref):
        # x_ref:     (1, C, HWt)  feature tile (channels on sublanes, spatial on lanes)
        # scale_ref: (1, C, 1)    precomputed (1 - aggregated attention), f32
        # wc_ref:    (C, C)       1x1 conv weight (out_c, in_c)
        # bc_ref:    (C, 1)       1x1 conv bias, f32
        # o_ref:     (1, C, HWt)
        x = x_ref[0]                          # [C, HWt] storage dtype
        scale = scale_ref[0]                  # [C, 1]   f32
        bc = bc_ref[...]                      # [C, 1]   f32
        xf = x.astype(jnp.float32)

        if use_vpu_conv:
            # Tiny channel count: unrolled VPU broadcast-MAC beats a <1%-utilized,
            # masked-vreg MXU dot (load/store slots are the scarce resource here).
            wcf = wc_ref[...].astype(jnp.float32)          # [C, C]
            C = wcf.shape[0]
            acc = wcf[:, 0:1] * xf[0:1, :]
            for c in range(1, C):
                acc = acc + wcf[:, c:c + 1] * xf[c:c + 1, :]
            conv = acc + bc                                # [C, HWt] f32
        else:
            # 1x1 conv == channel matmul, contracting over input channels (f32 acc).
            conv = jnp.dot(wc_ref[...], x,
                           preferred_element_type=jnp.float32) + bc

        # Residual + reversed-SE scaling + ReLU, all f32 on the VPU.
        out = jnp.maximum(xf + conv * scale, 0.0)
        o_ref[0] = out.astype(o_ref.dtype)

    return kernel


# ----------------------------- helpers -------------------------------------- #

def _mlp(a, w1, w2):
    # sigmoid(relu(a @ W1^T) @ W2^T), bias-free — matches nn.Sequential in the module.
    h = jnp.maximum(a @ w1.T, 0.0)
    return jax.nn.sigmoid(h @ w2.T)


def _vmem_budgets():
    """Per-generation (tile_pool_bytes, vmem_limit_cap_bytes)."""
    try:
        cap = int(pltpu.get_tpu_info().vmem_capacity_bytes)
    except Exception:
        cap = 64 << 20  # conservative (v7x-sized) fallback
    if cap >= (96 << 20):          # v5e / v6e: 128 MiB physical VMEM
        return 44 << 20, 64 << 20
    return 22 << 20, 40 << 20      # v7x: 64 MiB per TensorCore


def _pick_hw_tile(hw_pad, c, itemsize, tile_pool_bytes, n_buffers):
    """Largest multiple-of-128 divisor of hw_pad whose n_buffers copies fit the pool."""
    per_buf = max(tile_pool_bytes // n_buffers, 128 * c * itemsize)
    cap = max(128, (per_buf // (c * itemsize)) // 128 * 128)
    t = min(hw_pad, cap)
    t = max(128, (t // 128) * 128)
    while hw_pad % t != 0:
        t -= 128
    return t


# ----------------------------- wrapper -------------------------------------- #

def reversed_se_attention(feature_nchw, attentions_nlc, w1, w2, wc, bc,
                          *, extra_input_buffering=False):
    """feature_nchw: [N, C, H, W]; attentions_nlc: [N, L, C] (common L per batch).

    The kernel consumes `feature_nchw` in its own dtype (f32 or bf16 — no wrapper
    cast) and returns the same dtype.
    """
    N, C, H, W = feature_nchw.shape
    HW = H * W
    in_dtype = feature_nchw.dtype
    itemsize = jnp.dtype(in_dtype).itemsize

    # --- Tiny attention branch (hoisted out of the hot loop, f32, plain JAX). ---
    att = attentions_nlc.astype(jnp.float32)
    w1f = w1.astype(jnp.float32)
    w2f = w2.astype(jnp.float32)
    scale = 1.0 - jnp.mean(_mlp(_mlp(att, w1f, w2f), w1f, w2f), axis=1)   # [N, C]
    scale = scale[:, :, None]                                             # [N, C, 1] f32

    # --- Feature path: NCHW kept, spatial flattened onto lanes; pad HW to /128. ---
    x = feature_nchw.reshape(N, C, HW)                    # contiguous reshape, no transpose
    HW_pad = ((HW + 127) // 128) * 128
    if HW_pad != HW:
        x = jnp.pad(x, ((0, 0), (0, 0), (0, HW_pad - HW)))
    wc_s = wc.astype(in_dtype)                            # [C, C] (tiny cast)
    bc2 = bc.reshape(C, 1).astype(jnp.float32)

    # --- VMEM-budgeted tiling (per-generation). ---
    tile_pool, _limit_cap = _vmem_budgets()
    n_in_buf = 3 if extra_input_buffering else 2          # feature buffers
    n_buffers = n_in_buf + 2                              # + double-buffered output
    weights_bytes = 2 * C * C * itemsize                  # wc, double-buffered
    tile_pool_eff = max(tile_pool - weights_bytes, n_buffers * 128 * C * itemsize)
    tile_hw = _pick_hw_tile(HW_pad, C, itemsize, tile_pool_eff, n_buffers)

    tile_bytes = C * tile_hw * itemsize
    vmem_needed = (n_buffers * tile_bytes + weights_bytes
                   + 2 * (C * 4) * 2            # bias + scale blocks (tiny)
                   + (2 << 20))                 # headroom for internal scratch
    vmem_limit = max(vmem_needed, 16 << 20)

    # --- Grid: HW-tile axis leading so v7x's 2 TCs split work even at N == 1. ---
    grid = (HW_pad // tile_hw, N)
    use_vpu_conv = C < 8
    kernel = _make_kernel(use_vpu_conv)

    x_spec_kwargs = {}
    if extra_input_buffering:
        x_spec_kwargs["pipeline_mode"] = pl.Buffered(3)

    cost = pl.CostEstimate(
        flops=int(2 * N * C * C * HW_pad + 4 * N * C * HW_pad),
        transcendentals=0,
        bytes_accessed=int(2 * N * C * HW_pad * itemsize
                           + C * C * itemsize + N * C * 4 + C * 4),
    )

    out = pl.pallas_call(
        kernel,
        out_shape=jax.ShapeDtypeStruct((N, C, HW_pad), in_dtype),
        grid_spec=pltpu.PrefetchScalarGridSpec(
            num_scalar_prefetch=0,
            grid=grid,
            in_specs=[
                pl.BlockSpec((1, C, tile_hw), lambda t, n: (n, 0, t), **x_spec_kwargs),
                pl.BlockSpec((1, C, 1), lambda t, n: (n, 0, 0)),
                pl.BlockSpec((C, C), lambda t, n: (0, 0)),
                pl.BlockSpec((C, 1), lambda t, n: (0, 0)),
            ],
            out_specs=pl.BlockSpec((1, C, tile_hw), lambda t, n: (n, 0, t)),
        ),
        compiler_params=pltpu.CompilerParams(
            dimension_semantics=("parallel", "parallel"),
            vmem_limit_bytes=int(vmem_limit),
        ),
        cost_estimate=cost,
    )(x, scale, wc_s, bc2)

    if HW_pad != HW:
        out = out[:, :, :HW]
    return out.reshape(N, C, H, W)


# ----------------------------- reference ------------------------------------ #

def reference(feature_nchw, attentions_nlc, w1, w2, wc, bc):
    """Pure-JAX reference mirroring the PyTorch forward (f32)."""
    def mlp(a):
        return jax.nn.sigmoid(jnp.maximum(a @ w1.T, 0.0) @ w2.T)

    scale = 1.0 - jnp.mean(mlp(mlp(attentions_nlc)), axis=1)          # [N, C]
    conv = jnp.einsum("nchw,oc->nohw", feature_nchw, wc) + bc[None, :, None, None]
    return jnp.maximum(feature_nchw + conv * scale[:, :, None, None], 0.0)


# ----------------------------- test ----------------------------------------- #

if __name__ == "__main__":
    N, C, H, W = 2, 4, 16, 16
    L = 8
    reduction = 2
    Cr = C // reduction

    key = jax.random.PRNGKey(0)
    k_feat, k_att, k_w1, k_w2, k_wc, k_bc = jax.random.split(key, 6)

    feature = jax.random.normal(k_feat, (N, C, H, W), dtype=jnp.float32)
    attentions = jax.random.normal(k_att, (N, L, C), dtype=jnp.float32)

    # Deterministic "init" of the module parameters (shapes from __init__).
    w1 = jax.random.normal(k_w1, (Cr, C), dtype=jnp.float32) * 0.5   # Linear(C -> C//r), no bias
    w2 = jax.random.normal(k_w2, (C, Cr), dtype=jnp.float32) * 0.5   # Linear(C//r -> C), no bias
    wc = jax.random.normal(k_wc, (C, C), dtype=jnp.float32) * 0.5    # 1x1 conv weight
    bc = jax.random.normal(k_bc, (C,), dtype=jnp.float32) * 0.1      # 1x1 conv bias

    # f32 path (kernel consumes and emits f32 directly).
    out = jax.block_until_ready(reversed_se_attention(feature, attentions, w1, w2, wc, bc))
    ref = reference(feature, attentions, w1, w2, wc, bc)
    assert out.shape == (N, C, H, W)
    assert out.dtype == feature.dtype
    assert jnp.allclose(out, ref, atol=1e-5, rtol=1e-5)

    # bf16 path: caller hands bf16 feature (no wrapper-side cast); compare against a
    # reference fed the same bf16-quantized feature so only the accumulation path differs.
    feature_bf16 = feature.astype(jnp.bfloat16)
    out_bf16 = jax.block_until_ready(
        reversed_se_attention(feature_bf16, attentions, w1, w2, wc, bc))
    assert out_bf16.dtype == jnp.bfloat16
    ref_bf16 = reference(feature_bf16.astype(jnp.float32), attentions, w1, w2,
                         wc.astype(jnp.bfloat16).astype(jnp.float32), bc)
    assert jnp.allclose(out_bf16.astype(jnp.float32), ref_bf16, atol=2e-2, rtol=2e-2)

    # Non-128-divisible spatial extent (exercises the HW padding path).
    H2, W2 = 9, 13
    feature_odd = jax.random.normal(k_feat, (N, C, H2, W2), dtype=jnp.float32)
    out_odd = jax.block_until_ready(
        reversed_se_attention(feature_odd, attentions, w1, w2, wc, bc))
    ref_odd = reference(feature_odd, attentions, w1, w2, wc, bc)
    assert jnp.allclose(out_odd, ref_odd, atol=1e-5, rtol=1e-5)

    print("KERNEL_OK")
</pallas_src>

<mosaic_0001>
module attributes {stable_mosaic.version = 11 : i64} {
  func.func @kernel(%arg0: i32, %arg1: i32, %arg2: memref<1x4x256xf32, #tpu.memory_space<vmem>>, %arg3: memref<1x4x1xf32, #tpu.memory_space<vmem>>, %arg4: memref<4x4xf32, #tpu.memory_space<vmem>>, %arg5: memref<4x1xf32, #tpu.memory_space<vmem>>, %arg6: memref<1x4x256xf32, #tpu.memory_space<vmem>>) attributes {dimension_semantics = [#tpu.dimension_semantics<parallel>, #tpu.dimension_semantics<parallel>], iteration_bounds = array<i64: 1, 2>, scalar_prefetch = 0 : i64, scratch_operands = 0 : i64, tpu.core_type = #tpu.core_type<tc>, window_params = [{transform_indices = @transform_0, window_bounds = array<i64: 1, 4, 256>}, {transform_indices = @transform_1, window_bounds = array<i64: 1, 4, 1>}, {pipeline_mode = #tpu.pipeline_mode<synchronous>, transform_indices = @transform_2, window_bounds = array<i64: 4, 4>}, {pipeline_mode = #tpu.pipeline_mode<synchronous>, transform_indices = @transform_3, window_bounds = array<i64: 4, 1>}, {transform_indices = @transform_4, window_bounds = array<i64: 1, 4, 256>}]} {
    %c0 = arith.constant 0 : index
    %c0_0 = arith.constant 0 : index
    %c0_1 = arith.constant 0 : index
    %0 = vector.load %arg2[%c0, %c0_0, %c0_1] : memref<1x4x256xf32, #tpu.memory_space<vmem>>, vector<1x4x256xf32>
    %1 = vector.shape_cast %0 : vector<1x4x256xf32> to vector<4x256xf32>
    %c0_2 = arith.constant 0 : index
    %c0_3 = arith.constant 0 : index
    %c0_4 = arith.constant 0 : index
    %2 = vector.load %arg3[%c0_2, %c0_3, %c0_4] : memref<1x4x1xf32, #tpu.memory_space<vmem>>, vector<1x4x1xf32>
    %3 = vector.shape_cast %2 : vector<1x4x1xf32> to vector<4x1xf32>
    %c0_5 = arith.constant 0 : index
    %c0_6 = arith.constant 0 : index
    %4 = vector.load %arg5[%c0_5, %c0_6] : memref<4x1xf32, #tpu.memory_space<vmem>>, vector<4x1xf32>
    %c0_7 = arith.constant 0 : index
    %c0_8 = arith.constant 0 : index
    %5 = vector.load %arg4[%c0_7, %c0_8] : memref<4x4xf32, #tpu.memory_space<vmem>>, vector<4x4xf32>
    %6 = vector.extract_strided_slice %5 {offsets = [0, 0], sizes = [4, 1], strides = [1, 1]} : vector<4x4xf32> to vector<4x1xf32>
    %7 = vector.extract_strided_slice %1 {offsets = [0, 0], sizes = [1, 256], strides = [1, 1]} : vector<4x256xf32> to vector<1x256xf32>
    %8 = vector.broadcast %6 : vector<4x1xf32> to vector<4x256xf32>
    %9 = vector.broadcast %7 : vector<1x256xf32> to vector<4x256xf32>
    %10 = arith.mulf %8, %9 : vector<4x256xf32>
    %11 = vector.extract_strided_slice %5 {offsets = [0, 1], sizes = [4, 1], strides = [1, 1]} : vector<4x4xf32> to vector<4x1xf32>
    %12 = vector.extract_strided_slice %1 {offsets = [1, 0], sizes = [1, 256], strides = [1, 1]} : vector<4x256xf32> to vector<1x256xf32>
    %13 = vector.broadcast %11 : vector<4x1xf32> to vector<4x256xf32>
    %14 = vector.broadcast %12 : vector<1x256xf32> to vector<4x256xf32>
    %15 = arith.mulf %13, %14 : vector<4x256xf32>
    %16 = arith.addf %10, %15 : vector<4x256xf32>
    %17 = vector.extract_strided_slice %5 {offsets = [0, 2], sizes = [4, 1], strides = [1, 1]} : vector<4x4xf32> to vector<4x1xf32>
    %18 = vector.extract_strided_slice %1 {offsets = [2, 0], sizes = [1, 256], strides = [1, 1]} : vector<4x256xf32> to vector<1x256xf32>
    %19 = vector.broadcast %17 : vector<4x1xf32> to vector<4x256xf32>
    %20 = vector.broadcast %18 : vector<1x256xf32> to vector<4x256xf32>
    %21 = arith.mulf %19, %20 : vector<4x256xf32>
    %22 = arith.addf %16, %21 : vector<4x256xf32>
    %23 = vector.extract_strided_slice %5 {offsets = [0, 3], sizes = [4, 1], strides = [1, 1]} : vector<4x4xf32> to vector<4x1xf32>
    %24 = vector.extract_strided_slice %1 {offsets = [3, 0], sizes = [1, 256], strides = [1, 1]} : vector<4x256xf32> to vector<1x256xf32>
    %25 = vector.broadcast %23 : vector<4x1xf32> to vector<4x256xf32>
    %26 = vector.broadcast %24 : vector<1x256xf32> to vector<4x256xf32>
    %27 = arith.mulf %25, %26 : vector<4x256xf32>
    %28 = arith.addf %22, %27 : vector<4x256xf32>
    %29 = vector.broadcast %4 : vector<4x1xf32> to vector<4x256xf32>
    %30 = arith.addf %28, %29 : vector<4x256xf32>
    %31 = vector.broadcast %3 : vector<4x1xf32> to vector<4x256xf32>
    %32 = arith.mulf %30, %31 : vector<4x256xf32>
    %33 = arith.addf %1, %32 : vector<4x256xf32>
    %cst = arith.constant 0.000000e+00 : f32
    %34 = vector.broadcast %cst : f32 to vector<4x256xf32>
    %35 = arith.maximumf %33, %34 : vector<4x256xf32>
    %c0_9 = arith.constant 0 : index
    %c0_10 = arith.constant 0 : index
    %c0_11 = arith.constant 0 : index
    %36 = vector.load %arg6[%c0_9, %c0_10, %c0_11] : memref<1x4x256xf32, #tpu.memory_space<vmem>>, vector<1x4x256xf32>
    %37 = vector.shape_cast %36 : vector<1x4x256xf32> to vector<4x256xf32>
    %38 = vector.shape_cast %35 : vector<4x256xf32> to vector<1x4x256xf32>
    tpu.vector_store %arg6[%c0_9, %c0_10, %c0_11], %38 {strides = array<i32>} : memref<1x4x256xf32, #tpu.memory_space<vmem>>, vector<1x4x256xf32>,
    return
  }
  func.func @transform_0(%arg0: i32, %arg1: i32) -> (i32, i32, i32) {
    %c0_i32 = arith.constant 0 : i32
    %c0_i32_0 = arith.constant 0 : i32
    return %arg1, %c0_i32, %arg0 : i32, i32, i32
  }
  func.func @transform_1(%arg0: i32, %arg1: i32) -> (i32, i32, i32) {
    %c0_i32 = arith.constant 0 : i32
    %c0_i32_0 = arith.constant 0 : i32
    %c0_i32_1 = arith.constant 0 : i32
    return %arg1, %c0_i32, %c0_i32_0 : i32, i32, i32
  }
  func.func @transform_2(%arg0: i32, %arg1: i32) -> (i32, i32) {
    %c0_i32 = arith.constant 0 : i32
    %c0_i32_0 = arith.constant 0 : i32
    %c0_i32_1 = arith.constant 0 : i32
    return %c0_i32, %c0_i32_0 : i32, i32
  }
  func.func @transform_3(%arg0: i32, %arg1: i32) -> (i32, i32) {
    %c0_i32 = arith.constant 0 : i32
    %c0_i32_0 = arith.constant 0 : i32
    %c0_i32_1 = arith.constant 0 : i32
    return %c0_i32, %c0_i32_0 : i32, i32
  }
  func.func @transform_4(%arg0: i32, %arg1: i32) -> (i32, i32, i32) {
    %c0_i32 = arith.constant 0 : i32
    %c0_i32_0 = arith.constant 0 : i32
    return %arg1, %c0_i32, %arg0 : i32, i32, i32
  }
}

</mosaic_0001>

<bundles_post_ra>
// kernel: tpu_custom_call.1
= control target key start
LH: loop header
LB: loop body
LE: loop exit
PB: predicated region body
PF: predicated region fallthrough
CT: control target
= control target key end

     0   :  { %9 = vsyncpa [#allocation3], 0  ;;  %s819_s0 = inlined_call_operand.hbm [shape: f32[2,4,256], index: 0, kind: input, shape index: {}]   ;;  %s820_s1 = inlined_call_operand.vmem [shape: f32[2,4,1], index: 1, kind: input, shape index: {}]   ;;  %s821_s2 = inlined_call_operand.vmem [shape: f32[4,4], index: 2, kind: input, shape index: {}]   ;;  %s822_s3 = inlined_call_operand.vmem [shape: f32[4,1], index: 3, kind: input, shape index: {}]   ;;  %s823_s4 = inlined_call_operand.hbm [shape: f32[2,4,256], index: 4, kind: output, shape index: {}]  }
   0x1   :  { %11 = vsyncpa [#allocation3 + $0x1], 0 }
   0x2   :  { %12 = vsyncpa [#allocation4], 0 }
   0x3   :  { %14 = vsyncpa [#allocation4 + $0x1], 0  ;;  %s684_s15 = smov 0   ;;  %s686_s16 = smov 0  }
   0x4   :  { %s688_s17 = smov 0   ;;  %s690_s18 = smov 0  }
   0x5   :  { %s692_s19 = smov 0   ;;  %s694_s20 = smov 0  }
   0x6 LB: > { %s451_s21 = sadd.s32 4294967295, %s653_s20   ;;  %s452_s22 = sadd.s32 4294967294, %s653_s20   ;;  %s653_s20 = sphi %s694_s20, %s20_s20   ;;  %s649_s19 = sphi %s692_s19, %s832_s19   ;;  %s645_s18 = sphi %s690_s18, %s831_s18   ;;  %s641_s17 = sphi %s688_s17, %s830_s17   ;;  %s637_s16 = sphi %s686_s16, %s829_s16   ;;  %s633_s15 = sphi %s684_s15, %s828_s15  }
   0x7   : > { %s29_s23 = sadd.s32 1, %s649_s19  ;;  %s41_s24 = sadd.s32 1, %s641_s17 }
   0x8   : > { %p30_p0 = scmp.ge.s32.totalorder %s29_s23, 2  ;;  %p48_p1 = scmp.ne.s32.totalorder %s641_s17, %s637_s16 }
   0x9   : > { %p49_p2 = scmp.eq.s32.totalorder %s653_s20, 0  ;;  %p54_p3 = scmp.ne.s32.totalorder %s637_s16, %s633_s15 }
   0xa   : > { %s834_s23 = smov (%p30_p0, %s29_s23), 0  ;;  %p55_p5 = scmp.eq.s32.totalorder %s451_s21, 0 }
   0xb   : > { %p725_p4 = por %p49_p2, %p48_p1  ;;  %s36_s26 = ssub.s32 %s649_s19, %s834_s23 }
   0xc   : > { %p148_p6 = scmp.eq.s32.totalorder %s451_s21, 1  ;;  %p39_p7 = scmp.eq.s32.totalorder %s36_s26, 0 }
   0xd   : > { %p731_p8 = por %p55_p5, %p54_p3  ;;  %p154_p10 = scmp.eq.s32.totalorder %s452_s22, 1 }
   0xe   : > { %p735_p9 = por %p148_p6, %p48_p1  ;;  %p454_p12 = scmp.ge.s32.totalorder %s653_s20, 2 }
   0xf   : > { %s740_s29 = scalar_select %p39_p7, %s641_s17, %s41_s24  }
  0x10   : > { %p742_p11 = por %p154_p10, %p54_p3  ;;  %p481_p13 = scmp.lt.s32.totalorder %s653_s20, 2 }
  0x11   : > { %s180_s5 = sand.u32 1, %s641_s17   ;;  %s467_s7 = sshll.u32 %s649_s19, 3 }
  0x12   : > { %s455_s6 = sshll.u32 %s180_s5, 3  ;;  %s191_s10 = scalar_lea.hbm %s819_s0, %s467_s7 }
  0x13   : > { %s184_s11 = scalar_lea.vmem [#allocation2], %s455_s6  ;;  %s193_s13 = sshll.u32 %s191_s10, 4  ;;  %s194_s13 = int_to_ptr.hbm [resolvable:$true] %s193_s13 }
  0x14   : > { %s195_s12 = sshll.u32 %s184_s11, 4  ;;  %p474_p0 = pnand %p481_p13, %p725_p4  ;;  %s196_s12 = int_to_ptr.vmem [resolvable:$true] %s195_s12 }
  0x15   : > { %p458_p1 = scmp.ge.s32.totalorder %s653_s20, 1  ;;  %p207_p2 = scmp.lt.s32.totalorder %s653_s20, 3 }
  0x16   : > { %s181_s14 = scalar_lea.sflag [#allocation3], %s180_s5 }
  0x17   : > { %476 = dma.hbm_to_vmem [thread:$0]  (!%p474_p0), %s194_s13, 128, %s196_s12, %s181_s14  }
  0x18   : > { %p208_p3 = pnand %p458_p1, %p207_p2 }
  0x19   : > { %s758_s21 = sand.u32 (!%p208_p3), 1, %s637_s16  }
  0x1a   : > { %211 = sbr.rel (%p208_p3) target bundleno = 180 (0xb4), region = 36  ;;  %s459_s22 = sshll.u32 (!%p208_p3), %s758_s21, 3 }
  0x1b   : > { %s214_s24 = scalar_lea.sflag (!%p208_p3), [#allocation3], %s758_s21  ;;  %s217_s26 = scalar_lea.vmem (!%p208_p3), [#allocation2], %s459_s22 }
  0x1f   : > { %624 = dma.done.wait (%p731_p8), %s214_s24, 128  }
  0x20   : > { %626 = vsyncadd (%p731_p8), %s214_s24, 4294967168  ;;  %v655_v0 = vmov 0   ;;  %v656_v1 = vmov 2   ;;  %p248_p4 = scmp.lt.s32.totalorder %s645_s18, 1  ;;  %v256_v2 = vld [vmem:[%s821_s2] sm:$0xf] }
  0x21   : > { %535 = vset.pattern.permute.xlu0 %v655_v0  ;;  %537 = vset.pattern.permute.xlu1 %v656_v1  ;;  %v255_v3 = vld [vmem:[%s822_s3] sm:$0xf]  ;;  %v657_v5 = vmov 1   ;;  %v658_v6 = vmov 3   ;;  %s468_s12 = sshll.u32 %s645_s18, 3  ;;  %vm330_vm0 = vcmask 1043456  }
  0x22   : > { %539 = vset.pattern.permute.xlu2 %v655_v0  ;;  %s249_s25 = scalar_select %p248_p4, %s645_s18, 1  ;;  %259 = vperm.xlu0 %535, %v256_v2   ;;  %v253_v7 = vld [vmem:[%s217_s26] sm:$0xff] }
  0x23   : > { %286 = vperm.xlu1 %537, %v256_v2   ;;  %315 = vperm.xlu2 %539, %v255_v3   ;;  %v263_v10 = vperm.slane %v253_v7, 0  ;;  %v264_v11 = vperm.slane %v253_v7, 4  ;;  %v275_v12 = vperm.slane %v253_v7, 1  ;;  %v276_v13 = vperm.slane %v253_v7, 5  ;;  %s350_s24 = scalar_lea.hbm %s823_s4, %s468_s12  ;;  %s246_s26 = scalar_lea.vmem [#allocation5], %s459_s22 }
  0x24   : > { %s461_s27 = sshll.u32 %s249_s25, 2  ;;  %v289_v14 = vperm.slane %v253_v7, 2  ;;  %v290_v15 = vperm.slane %v253_v7, 6  ;;  %v303_v16 = vperm.slane %v253_v7, 3  ;;  %v304_v17 = vperm.slane %v253_v7, 7  ;;  %s352_s25 = sshll.u32 %s246_s26, 4  ;;  %s353_s25 = int_to_ptr.vmem [resolvable:$true] %s352_s25 }
  0x25   : > { %s251_s11 = scalar_lea.vmem %s820_s1, %s461_s27  ;;  %v267_v18 = vperm.slane %v263_v10, 0  ;;  %v268_v19 = vperm.slane %v264_v11, 0  ;;  %v279_v20 = vperm.slane %v275_v12, 1  ;;  %v280_v21 = vperm.slane %v276_v13, 1  ;;  %s354_s5 = sshll.u32 %s350_s24, 4  ;;  %s355_s5 = int_to_ptr.hbm [resolvable:$true] %s354_s5 }
  0x26   : > { %v254_v4 = vld [vmem:[%s251_s11] sm:$0xf]  ;;  %v293_v22 = vperm.slane %v289_v14, 2  ;;  %v294_v23 = vperm.slane %v290_v15, 2  ;;  %v307_v25 = vperm.slane %v303_v16, 3  ;;  %v308_v26 = vperm.slane %v304_v17, 3 }
  0x27   : > { %s337_s18 = scalar_lea.sflag [#allocation4], %s758_s21  ;;  %s585_s6 = sshra.s32 %s355_s5, 4  ;;  %s586_s6 = int_to_ptr.hbm [resolvable:$true] %s585_s6 }
  0x28   : > { %s587_s7 = scalar_lea.hbm %s586_s6, 8  ;;  %s591_s9 = scalar_lea.hbm %s823_s4, 16 }
  0x29   : > { %p588_p5 = scmp.ne.s32.totalorder %s586_s6, %s587_s7  ;;  %p592_p8 = scmp.lt.s32.totalorder %s586_s6, %s823_s4 }
  0x2a   : > { %536 = vset.pattern.permute.xlu0 %v657_v5  ;;  %p593_p10 = scmp.lt.s32.totalorder %s591_s9, %s587_s7 }
  0x2b   : > { %538 = vset.pattern.permute.xlu1 %v658_v6  ;;  %272 = vperm.xlu0 %536, %v256_v2   ;;  %p589_p6 = pnand %p588_p5, %p735_p9 }
  0x2c   : > { %300 = vperm.xlu1 %538, %v256_v2   ;;  %322 = vperm.xlu2 %539, %v254_v4   ;;  %p594_p13 = por %p593_p10, %p592_p8 }
  0x2d   : > { %p590_p7 = pneg %p589_p6 }
  0x2f   : > { %p595_p0 = pnand %p594_p13, %p590_p7 }
  0x33   : > { %540 = vset.pattern.permute.xlu0 %v655_v0 }
  0x7d   : > { %v316_v24 = vpop.permute.xlu2 %315 }
  0x86   : > { %v323_v45 = vpop.permute.xlu2 %322 }
  0x94   : > { %v260_v8 = vpop.permute.xlu0 %259 }
  0x95   : > { %v287_v9 = vpop.permute.xlu1 %286  ;;  %v269_v29 = vmul.f32 %v267_v18, %v260_v8  ;;  %v270_v30 = vmul.f32 %v268_v19, %v260_v8 }
  0x96   : > { %v295_v33 = vmul.f32 %v293_v22, %v287_v9  ;;  %v296_v34 = vmul.f32 %v294_v23, %v287_v9 }
  0x9d   : > { %v273_v27 = vpop.permute.xlu0 %272 }
  0x9e   : > { %v301_v28 = vpop.permute.xlu1 %300  ;;  %v281_v31 = vmul.f32 %v279_v20, %v273_v27  ;;  %v282_v32 = vmul.f32 %v280_v21, %v273_v27 }
  0x9f   : > { %v309_v37 = vmul.f32 %v307_v25, %v301_v28  ;;  %v310_v38 = vmul.f32 %v308_v26, %v301_v28 }
  0xa0   : > { %v283_v35 = vadd.f32 %v281_v31, %v269_v29  ;;  %v284_v36 = vadd.f32 %v282_v32, %v270_v30 }
  0xa2   : > { %v297_v39 = vadd.f32 %v295_v33, %v283_v35  ;;  %v298_v40 = vadd.f32 %v296_v34, %v284_v36 }
  0xa4   : > { %v311_v41 = vadd.f32 %v309_v37, %v297_v39  ;;  %v312_v42 = vadd.f32 %v310_v38, %v298_v40 }
  0xa6   : > { %v318_v43 = vadd.f32 %v316_v24, %v311_v41  ;;  %v319_v44 = vadd.f32 %v316_v24, %v312_v42 }
  0xa8   : > { %v326_v46 = vmul.f32 %v323_v45, %v319_v44  ;;  %v325_v47 = vmul.f32 %v323_v45, %v318_v43 }
  0xaa   : > { %v329_v48 = vrot.slane %v326_v46, 4 }
  0xac   : > { %v331_v49 = vsel %vm330_vm0, %v325_v47, %v329_v48 }
  0xad   : > { %v333_v50 = vadd.f32 %v331_v49, %v253_v7 }
  0xaf   : > { %v334_v51 = vmax.f32 %v333_v50, 0.0 }
  0xb1   : > { %335 = vst [vmem:[%s246_s26] sm:$0xff] %v334_v51 }
  0xb2   : > { %598 = shalt.err (!%p595_p0)
}
  0xb3   : > { %471 = dma.vmem_to_hbm [thread:$0]  (%p735_p9), %s353_s25, 128, %s355_s5, %s337_s18  }
  0xb4 PF: > { %s366_s21 = sand.u32 1, %s633_s15   ;;  %p478_p1 = pnand %p454_p12, %p742_p11 }
  0xb5   : > { %s367_s11 = scalar_lea.sflag [#allocation4], %s366_s21 }
  0xb6   : > { %p479_p2 = pneg %p478_p1 }
  0xb8   : > { %628 = dma.done.wait (%p479_p2), %s367_s11, 128  }
  0xb9   : > { %630 = vsyncadd (%p479_p2), %s367_s11, 4294967168  ;;  %s20_s20 = sadd.s32 1, %s653_s20   ;;  %s828_s15 = smov %s637_s16 }
  0xba   : > { %p17_p3 = scmp.ge.s32.totalorder %s20_s20, 4   ;;  %s829_s16 = smov %s641_s17 }
  0xbb   : > { %s830_s17 = smov %s740_s29  ;;  %s831_s18 = smov %s649_s19 }
  0xbc   : > { %s832_s19 = smov %s834_s23  ;;  %19 = sbr.rel (!%p17_p3) target bundleno = 6 (0x6), region = 84 }
  0xc1   :  { %373 = vsyncpa [#allocation3], 1 }
  0xc2   :  { %375 = vsyncpa [#allocation3 + $0x1], 1 }
  0xc3   :  { %376 = vsyncpa [#allocation4], 1 }
  0xc4   :  { %378 = vsyncpa [#allocation4 + $0x1], 1 }

</bundles_post_ra>
